<compile_context>
chip_gen: v6e
topology: v6e:2x2x1
jax: 0.10.0
libtpu: 0.0.40
codegen_flags: <defaults>
</compile_context>

<pallas_src>
import functools
import math

import jax
import jax.numpy as jnp
from jax.experimental import pallas as pl
from jax.experimental.pallas import tpu as pltpu


# ---------------------------------------------------------------------------
# VMEM budgets (conservative for v7x's 64 MiB; v5e/v6e have 128 MiB).
# ---------------------------------------------------------------------------
_VMEM_CAP = 48 * 2**20            # never request more scoped VMEM than this
_LINEAR_TILE_BUDGET = 24 * 2**20  # double-buffered tiles of a plain linear
_FUSED_LN_BUDGET = 32 * 2**20     # resident weight + tiles of the fused LN path


def _vmem_limit(need_bytes):
    """Scoped-VMEM request: 2x headroom for temporaries, floor 16 MiB, cap 48."""
    return int(min(_VMEM_CAP, max(2 * need_bytes + 4 * 2**20, 16 * 2**20)))


# ---------------------------------------------------------------------------
# Tiling helpers (largest evenly-dividing, HW-aligned tile).
# ---------------------------------------------------------------------------
def _row_tile(m, cap=256):
    if m <= cap:
        return m
    for t in range(cap, 7, -1):
        if m % t == 0 and t % 8 == 0:
            return t
    return m


def _col_tile(n, cap=512):
    if n <= cap:
        return n
    for t in range(cap, 127, -1):
        if n % t == 0 and t % 128 == 0:
            return t
    return n


def _pick_linear_tiles(M, K, N):
    tm = _row_tile(M, 256)
    tn = _col_tile(N, 512)

    def need(tm_, tn_):  # double-buffered f32 x-tile + w-tile + out-tile
        return 8 * (tm_ * K + tn_ * K + tm_ * tn_)

    while need(tm, tn) > _LINEAR_TILE_BUDGET and tn % 256 == 0:
        tn //= 2
    while need(tm, tn) > _LINEAR_TILE_BUDGET and tm % 16 == 0:
        tm //= 2
    return tm, tn, need(tm, tn)


# ---------------------------------------------------------------------------
# In-kernel math helpers.
# ---------------------------------------------------------------------------
def _erf_approx(x):
    # Abramowitz & Stegun 7.1.26 rational approximation (|err| <= 1.5e-7).
    a1 = 0.254829592
    a2 = -0.284496736
    a3 = 1.421413741
    a4 = -1.453152027
    a5 = 1.061405429
    p = 0.3275911
    sign = jnp.where(x >= 0.0, 1.0, -1.0)
    ax = jnp.abs(x)
    # Divide moved to the (otherwise idle) EUP slot.
    t = pl.reciprocal(1.0 + p * ax, approx=True)
    poly = ((((a5 * t + a4) * t + a3) * t + a2) * t + a1) * t
    return sign * (1.0 - poly * jnp.exp(-ax * ax))


def _gelu(x):
    # BERT gelu: x * 0.5 * (1 + erf(x / sqrt(2)))
    return x * 0.5 * (1.0 + _erf_approx(x * 0.7071067811865476))


def _layernorm_f32(h, gamma, beta, eps):
    mu = jnp.mean(h, axis=-1, keepdims=True)
    d = h - mu
    var = jnp.mean(d * d, axis=-1, keepdims=True)
    inv = jax.lax.rsqrt(var + eps)
    return d * inv * gamma + beta


# ---------------------------------------------------------------------------
# Kernels.
# ---------------------------------------------------------------------------
def _linear_kernel(x_ref, w_ref, b_ref, o_ref, *, act):
    # x:(TM,K)  w:(TN,K) (PyTorch convention)  ->  y = x @ w.T + b
    y = jax.lax.dot_general(
        x_ref[...].astype(jnp.bfloat16), w_ref[...].astype(jnp.bfloat16),
        dimension_numbers=(((1,), (1,)), ((), ())),
        preferred_element_type=jnp.float32)
    y = y + b_ref[...]
    if act == "gelu":
        y = _gelu(y)
    o_ref[...] = y.astype(o_ref.dtype)


def _linear_res_ln_kernel(x_ref, w_ref, b_ref, r_ref, g_ref, be_ref, o_ref,
                          *, eps):
    # LayerNorm((x @ w.T + b) + residual) with the full (N, K) weight resident.
    y = jax.lax.dot_general(
        x_ref[...].astype(jnp.bfloat16), w_ref[...].astype(jnp.bfloat16),
        dimension_numbers=(((1,), (1,)), ((), ())),
        preferred_element_type=jnp.float32)
    h = y + b_ref[...] + r_ref[...].astype(jnp.float32)
    o_ref[...] = _layernorm_f32(h, g_ref[...], be_ref[...], eps).astype(o_ref.dtype)


def _add_ln_kernel(x_ref, r_ref, g_ref, b_ref, o_ref, *, eps):
    h = x_ref[...].astype(jnp.float32) + r_ref[...].astype(jnp.float32)
    o_ref[...] = _layernorm_f32(h, g_ref[...], b_ref[...], eps).astype(o_ref.dtype)


def _attention_kernel(qkv_ref, m_ref, o_ref, *, num_heads, head_dim, hidden,
                      tq, scale):
    # qkv_ref: (S, 3H) fused projection for one batch element (resident across
    # the q-tile axis).  m_ref: (1, S) additive mask.  o_ref: (tq, H).
    qi = pl.program_id(1)
    row0 = pl.multiple_of(qi * tq, tq)
    mask = m_ref[...]                                     # (1, S) f32
    for h in range(num_heads):                            # static unroll
        c0 = h * head_dim
        # Scale folded into q (tq*dh muls instead of tq*S).
        q = (qkv_ref[pl.ds(row0, tq), pl.ds(c0, head_dim)]
             .astype(jnp.float32) * scale).astype(jnp.bfloat16)
        k = qkv_ref[:, pl.ds(hidden + c0, head_dim)].astype(jnp.bfloat16)
        v = qkv_ref[:, pl.ds(2 * hidden + c0, head_dim)].astype(jnp.bfloat16)
        s = jax.lax.dot_general(
            q, k, dimension_numbers=(((1,), (1,)), ((), ())),
            preferred_element_type=jnp.float32)            # (tq, S)
        s = s + mask
        s = s - jnp.max(s, axis=-1, keepdims=True)
        p = jnp.exp(s)
        inv = pl.reciprocal(jnp.sum(p, axis=-1, keepdims=True), approx=True)
        ctx = jnp.dot(p.astype(jnp.bfloat16), v,
                      preferred_element_type=jnp.float32) * inv
        o_ref[:, c0:c0 + head_dim] = ctx.astype(o_ref.dtype)


# ---------------------------------------------------------------------------
# Pallas wrappers.
# ---------------------------------------------------------------------------
def pallas_linear(x, w, b, act=None):
    """x:(M,K), w:(N,K) PyTorch convention, b:(N,). Returns act(x @ w.T + b)."""
    M, K = x.shape
    N = w.shape[0]
    tm, tn, need = _pick_linear_tiles(M, K, N)
    b2 = b.reshape(1, N)

    # Choose grid order by estimated HBM traffic (elements):
    #   O1 (M-tiles outer): x streamed once, weight re-streamed M/tm times.
    #   O2 (N-tiles outer): weight streamed once, x re-streamed N/tn times.
    o1 = M * K + pl.cdiv(M, tm) * N * K
    o2 = N * K + pl.cdiv(N, tn) * M * K
    if o2 <= o1:
        grid = (N // tn, M // tm)
        x_map = lambda j, i: (i, 0)
        w_map = lambda j, i: (j, 0)
        b_map = lambda j, i: (0, j)
        o_map = lambda j, i: (i, j)
    else:
        grid = (M // tm, N // tn)
        x_map = lambda i, j: (i, 0)
        w_map = lambda i, j: (j, 0)
        b_map = lambda i, j: (0, j)
        o_map = lambda i, j: (i, j)

    flops = 2 * M * N * K
    trans = M * N if act == "gelu" else 0
    bytes_acc = 4 * (min(o1, o2) + M * N + N)
    kernel = functools.partial(_linear_kernel, act=act)
    return pl.pallas_call(
        kernel,
        out_shape=jax.ShapeDtypeStruct((M, N), x.dtype),
        grid_spec=pltpu.PrefetchScalarGridSpec(
            num_scalar_prefetch=0,
            grid=grid,
            in_specs=[
                pl.BlockSpec((tm, K), x_map),
                pl.BlockSpec((tn, K), w_map),
                pl.BlockSpec((1, tn), b_map),
            ],
            out_specs=pl.BlockSpec((tm, tn), o_map),
        ),
        compiler_params=pltpu.CompilerParams(
            dimension_semantics=("parallel", "parallel"),
            vmem_limit_bytes=_vmem_limit(need)),
        cost_estimate=pl.CostEstimate(
            flops=flops, transcendentals=trans, bytes_accessed=int(bytes_acc)),
    )(x, w, b2)


def pallas_add_layernorm(x, residual, gamma, beta, eps=1e-12):
    """LayerNorm(x + residual); fallback path when the fused LN does not fit."""
    M, H = x.shape
    tm = _row_tile(M)
    g2 = gamma.reshape(1, H)
    b2 = beta.reshape(1, H)
    need = 8 * (3 * tm * H + 2 * H)
    kernel = functools.partial(_add_ln_kernel, eps=eps)
    return pl.pallas_call(
        kernel,
        out_shape=jax.ShapeDtypeStruct((M, H), x.dtype),
        grid_spec=pltpu.PrefetchScalarGridSpec(
            num_scalar_prefetch=0,
            grid=(M // tm,),
            in_specs=[
                pl.BlockSpec((tm, H), lambda i: (i, 0)),
                pl.BlockSpec((tm, H), lambda i: (i, 0)),
                pl.BlockSpec((1, H), lambda i: (0, 0)),
                pl.BlockSpec((1, H), lambda i: (0, 0)),
            ],
            out_specs=pl.BlockSpec((tm, H), lambda i: (i, 0)),
        ),
        compiler_params=pltpu.CompilerParams(
            dimension_semantics=("parallel",),
            vmem_limit_bytes=_vmem_limit(need)),
        cost_estimate=pl.CostEstimate(
            flops=8 * M * H, transcendentals=0, bytes_accessed=4 * 3 * M * H),
    )(x, residual, g2, b2)


def pallas_linear_res_ln(x, w, b, residual, gamma, beta, eps=1e-12):
    """LayerNorm(x @ w.T + b + residual) with the weight resident in VMEM."""
    M, K = x.shape
    N = w.shape[0]
    tm = _row_tile(M, 256)
    w_resident = 2 * (N * K * 2)                     # bf16 weight, double-buffered

    def need(tm_):                                   # + f32 x / residual / out tiles
        return w_resident + 8 * (tm_ * K + 2 * tm_ * N) + 16 * N

    while need(tm) > _FUSED_LN_BUDGET and tm % 16 == 0:
        tm //= 2
    if need(tm) > _FUSED_LN_BUDGET:
        # Resident-weight fusion would blow VMEM (e.g. very wide intermediate
        # sizes on v7x) -> unfused linear + standalone add&LayerNorm.
        y = pallas_linear(x, w, b)
        return pallas_add_layernorm(y, residual, gamma, beta, eps=eps)

    # Pre-cast once so the resident weight is not re-cast every grid step.
    w_bf16 = w if w.dtype == jnp.bfloat16 else w.astype(jnp.bfloat16)
    b2 = b.reshape(1, N)
    g2 = gamma.reshape(1, N)
    be2 = beta.reshape(1, N)
    flops = 2 * M * N * K + 8 * M * N
    bytes_acc = 4 * (M * K + 2 * M * N + 3 * N) + 2 * N * K
    kernel = functools.partial(_linear_res_ln_kernel, eps=eps)
    return pl.pallas_call(
        kernel,
        out_shape=jax.ShapeDtypeStruct((M, N), x.dtype),
        grid_spec=pltpu.PrefetchScalarGridSpec(
            num_scalar_prefetch=0,
            grid=(M // tm,),
            in_specs=[
                pl.BlockSpec((tm, K), lambda i: (i, 0)),
                pl.BlockSpec((N, K), lambda i: (0, 0)),   # resident weight
                pl.BlockSpec((1, N), lambda i: (0, 0)),
                pl.BlockSpec((tm, N), lambda i: (i, 0)),
                pl.BlockSpec((1, N), lambda i: (0, 0)),
                pl.BlockSpec((1, N), lambda i: (0, 0)),
            ],
            out_specs=pl.BlockSpec((tm, N), lambda i: (i, 0)),
        ),
        compiler_params=pltpu.CompilerParams(
            dimension_semantics=("parallel",),
            vmem_limit_bytes=_vmem_limit(need(tm))),
        cost_estimate=pl.CostEstimate(
            flops=flops, transcendentals=0, bytes_accessed=int(bytes_acc)),
    )(x, w_bf16, b2, residual, g2, be2)


def pallas_attention(qkv, ext_mask, num_heads):
    """qkv:(B,S,3H) fused projection; ext_mask:(B,1,1,S). Returns (B,S,H)."""
    B, S, H3 = qkv.shape
    H = H3 // 3
    dh = H // num_heads
    tq = _row_tile(S, 256)
    scale = 1.0 / math.sqrt(dh)
    mask3 = ext_mask.reshape(B, 1, S)
    kernel = functools.partial(_attention_kernel, num_heads=num_heads,
                               head_dim=dh, hidden=H, tq=tq, scale=scale)
    need = 8 * (S * H3 + tq * H + S)
    flops = 4 * B * num_heads * S * S * dh
    bytes_acc = 4 * (B * S * H3 + B * S + B * S * H)
    return pl.pallas_call(
        kernel,
        out_shape=jax.ShapeDtypeStruct((B, S, H), qkv.dtype),
        grid_spec=pltpu.PrefetchScalarGridSpec(
            num_scalar_prefetch=0,
            grid=(B, S // tq),
            in_specs=[
                # Full (S, 3H) block: resident across the q-tile axis.
                pl.BlockSpec((None, S, H3), lambda b, qi: (b, 0, 0)),
                pl.BlockSpec((None, 1, S), lambda b, qi: (b, 0, 0)),
            ],
            out_specs=pl.BlockSpec((None, tq, H), lambda b, qi: (b, qi, 0)),
        ),
        compiler_params=pltpu.CompilerParams(
            dimension_semantics=("parallel", "arbitrary"),
            vmem_limit_bytes=_vmem_limit(need)),
        cost_estimate=pl.CostEstimate(
            flops=flops, transcendentals=B * num_heads * S * S,
            bytes_accessed=int(bytes_acc)),
    )(qkv, mask3)


# ---------------------------------------------------------------------------
# BertLayer / BertEncoder forward.
# ---------------------------------------------------------------------------
def bert_layer(hidden, ext_mask, p, num_heads):
    B, S, H = hidden.shape
    x2 = hidden.reshape(B * S, H)

    # Fused QKV projection (hidden states read once, one kernel launch).
    qkv = pallas_linear(x2, p["w_qkv"], p["b_qkv"])                  # (B*S, 3H)
    ctx = pallas_attention(qkv.reshape(B, S, 3 * H), ext_mask, num_heads)
    ctx2 = ctx.reshape(B * S, H)                                     # free reshape

    # BertSelfOutput: dense + residual + LayerNorm, fused.
    attn_out = pallas_linear_res_ln(ctx2, p["w_ao"], p["b_ao"], x2,
                                    p["ln1_g"], p["ln1_b"])
    # BertIntermediate: dense + GELU, fused.
    inter = pallas_linear(attn_out, p["w_i"], p["b_i"], act="gelu")
    # BertOutput: dense + residual + LayerNorm, fused.
    out = pallas_linear_res_ln(inter, p["w_o"], p["b_o"], attn_out,
                               p["ln2_g"], p["ln2_b"])
    return out.reshape(B, S, H)


def bert_encoder(hidden_states, attention_mask, layer_params, num_heads,
                 output_all_encoded_layers=True):
    all_encoder_layers = []
    x = hidden_states
    for p in layer_params:
        x = bert_layer(x, attention_mask, p, num_heads)
        if output_all_encoded_layers:
            all_encoder_layers.append(x)
    if not output_all_encoded_layers:
        all_encoder_layers.append(x)
    return all_encoder_layers


# ---------------------------------------------------------------------------
# Plain-JAX reference (mirrors the PyTorch module, eval mode).
# ---------------------------------------------------------------------------
def _ref_layernorm(x, g, b, eps=1e-12):
    u = jnp.mean(x, axis=-1, keepdims=True)
    s = jnp.mean((x - u) ** 2, axis=-1, keepdims=True)
    return (x - u) / jnp.sqrt(s + eps) * g + b


def _ref_layer(x, ext_mask, p, num_heads):
    B, S, H = x.shape
    dh = H // num_heads
    lin = lambda z, w, b: z @ w.T + b

    def split_heads(z):
        return z.reshape(B, S, num_heads, dh).transpose(0, 2, 1, 3)

    q = split_heads(lin(x, p["wq"], p["bq"]))
    k = split_heads(lin(x, p["wk"], p["bk"]))
    v = split_heads(lin(x, p["wv"], p["bv"]))
    scores = jnp.einsum("bhqd,bhkd->bhqk", q, k) / math.sqrt(dh) + ext_mask
    probs = jax.nn.softmax(scores, axis=-1)
    ctx = jnp.einsum("bhqk,bhkd->bhqd", probs, v)
    ctx = ctx.transpose(0, 2, 1, 3).reshape(B, S, H)
    ao = lin(ctx, p["w_ao"], p["b_ao"])
    attn_out = _ref_layernorm(ao + x, p["ln1_g"], p["ln1_b"])
    inter = lin(attn_out, p["w_i"], p["b_i"])
    inter = inter * 0.5 * (1.0 + jax.lax.erf(inter / math.sqrt(2.0)))
    ffn = lin(inter, p["w_o"], p["b_o"])
    return _ref_layernorm(ffn + attn_out, p["ln2_g"], p["ln2_b"])


def _ref_encoder(x, ext_mask, params, num_heads):
    outs = []
    for p in params:
        x = _ref_layer(x, ext_mask, p, num_heads)
        outs.append(x)
    return outs


# ---------------------------------------------------------------------------
# Deterministic parameter construction.
# ---------------------------------------------------------------------------
def init_layer_params(key, hidden, intermediate):
    ks = jax.random.split(key, 16)

    def lin(kw, kb, dout, din):
        w = jax.random.normal(kw, (dout, din), jnp.float32) * 0.02
        b = jax.random.normal(kb, (dout,), jnp.float32) * 0.02
        return w, b

    wq, bq = lin(ks[0], ks[1], hidden, hidden)
    wk, bk = lin(ks[2], ks[3], hidden, hidden)
    wv, bv = lin(ks[4], ks[5], hidden, hidden)
    w_ao, b_ao = lin(ks[6], ks[7], hidden, hidden)
    w_i, b_i = lin(ks[8], ks[9], intermediate, hidden)
    w_o, b_o = lin(ks[10], ks[11], hidden, intermediate)
    ln1_g = 1.0 + 0.1 * jax.random.normal(ks[12], (hidden,), jnp.float32)
    ln1_b = 0.02 * jax.random.normal(ks[13], (hidden,), jnp.float32)
    ln2_g = 1.0 + 0.1 * jax.random.normal(ks[14], (hidden,), jnp.float32)
    ln2_b = 0.02 * jax.random.normal(ks[15], (hidden,), jnp.float32)
    return dict(
        wq=wq, bq=bq, wk=wk, bk=bk, wv=wv, bv=bv,
        w_ao=w_ao, b_ao=b_ao, w_i=w_i, b_i=b_i, w_o=w_o, b_o=b_o,
        ln1_g=ln1_g, ln1_b=ln1_b, ln2_g=ln2_g, ln2_b=ln2_b,
        # Pre-concatenated QKV for the fused projection kernel.
        w_qkv=jnp.concatenate([wq, wk, wv], axis=0),
        b_qkv=jnp.concatenate([bq, bk, bv], axis=0))


if __name__ == "__main__":
    B, S, H = 2, 8, 32
    NUM_HEADS = 4
    INTERMEDIATE = 64
    NUM_LAYERS = 2

    root = jax.random.PRNGKey(0)
    k_in, k_params = jax.random.split(root)
    hidden_states = jax.random.normal(k_in, (B, S, H), dtype=jnp.float32)

    layer_keys = jax.random.split(k_params, NUM_LAYERS)
    params = [init_layer_params(k, H, INTERMEDIATE) for k in layer_keys]

    # Padding mask: batch 0 fully attended, batch 1 has the last 3 tokens padded.
    token_mask = jnp.array([[1.0] * S, [1.0] * (S - 3) + [0.0] * 3],
                           dtype=jnp.float32)
    ext_mask = (1.0 - token_mask)[:, None, None, :] * -10000.0       # (B,1,1,S)

    outs = bert_encoder(hidden_states, ext_mask, params, NUM_HEADS,
                        output_all_encoded_layers=True)
    for o in outs:
        jax.block_until_ready(o)

    refs = _ref_encoder(hidden_states, ext_mask, params, NUM_HEADS)
    assert len(outs) == NUM_LAYERS
    for o, r in zip(outs, refs):
        assert o.shape == (B, S, H)
        err = float(jnp.max(jnp.abs(o - r)))
        assert jnp.allclose(o, r, atol=2e-2, rtol=2e-2), f"max abs err {err}"
    print("KERNEL_OK")
</pallas_src>

<mosaic_0001>
module attributes {stable_mosaic.version = 11 : i64} {
  func.func @_linear_kernel(%arg0: i32, %arg1: i32, %arg2: memref<16x32xf32, #tpu.memory_space<vmem>>, %arg3: memref<96x32xf32, #tpu.memory_space<vmem>>, %arg4: memref<1x96xf32, #tpu.memory_space<vmem>>, %arg5: memref<16x96xf32, #tpu.memory_space<vmem>>) attributes {dimension_semantics = [#tpu.dimension_semantics<parallel>, #tpu.dimension_semantics<parallel>], iteration_bounds = array<i64: 1, 1>, scalar_prefetch = 0 : i64, scratch_operands = 0 : i64, tpu.core_type = #tpu.core_type<tc>, window_params = [{transform_indices = @transform_0, window_bounds = array<i64: 16, 32>}, {transform_indices = @transform_1, window_bounds = array<i64: 96, 32>}, {transform_indices = @transform_2, window_bounds = array<i64: 1, 96>}, {transform_indices = @transform_3, window_bounds = array<i64: 16, 96>}]} {
    %c0 = arith.constant 0 : index
    %c0_0 = arith.constant 0 : index
    %0 = vector.load %arg2[%c0, %c0_0] : memref<16x32xf32, #tpu.memory_space<vmem>>, vector<16x32xf32>
    %1 = arith.truncf %0 : vector<16x32xf32> to vector<16x32xbf16>
    %c0_1 = arith.constant 0 : index
    %c0_2 = arith.constant 0 : index
    %2 = vector.load %arg3[%c0_1, %c0_2] : memref<96x32xf32, #tpu.memory_space<vmem>>, vector<96x32xf32>
    %3 = arith.truncf %2 : vector<96x32xf32> to vector<96x32xbf16>
    %cst = arith.constant dense<0.000000e+00> : vector<16x96xf32>
    %4 = tpu.matmul %1, %3, %cst {dimension_numbers = #tpu.dot_dimension_numbers<[1], [1], [0], [0], [0, 0, 1, 0], [], []>} : vector<16x32xbf16>, vector<96x32xbf16>, vector<16x96xf32> -> vector<16x96xf32>
    %c0_3 = arith.constant 0 : index
    %c0_4 = arith.constant 0 : index
    %5 = vector.load %arg4[%c0_3, %c0_4] : memref<1x96xf32, #tpu.memory_space<vmem>>, vector<1x96xf32>
    %6 = vector.broadcast %5 : vector<1x96xf32> to vector<16x96xf32>
    %7 = arith.addf %4, %6 : vector<16x96xf32>
    %c0_5 = arith.constant 0 : index
    %c0_6 = arith.constant 0 : index
    %8 = vector.load %arg5[%c0_5, %c0_6] : memref<16x96xf32, #tpu.memory_space<vmem>>, vector<16x96xf32>
    tpu.vector_store %arg5[%c0_5, %c0_6], %7 {strides = array<i32>} : memref<16x96xf32, #tpu.memory_space<vmem>>, vector<16x96xf32>,
    return
  }
  func.func @transform_0(%arg0: i32, %arg1: i32) -> (i32, i32) {
    %c0_i32 = arith.constant 0 : i32
    %c0_i32_0 = arith.constant 0 : i32
    return %arg1, %c0_i32 : i32, i32
  }
  func.func @transform_1(%arg0: i32, %arg1: i32) -> (i32, i32) {
    %c0_i32 = arith.constant 0 : i32
    %c0_i32_0 = arith.constant 0 : i32
    return %arg0, %c0_i32 : i32, i32
  }
  func.func @transform_2(%arg0: i32, %arg1: i32) -> (i32, i32) {
    %c0_i32 = arith.constant 0 : i32
    %c0_i32_0 = arith.constant 0 : i32
    return %c0_i32, %arg0 : i32, i32
  }
  func.func @transform_3(%arg0: i32, %arg1: i32) -> (i32, i32) {
    %c0_i32 = arith.constant 0 : i32
    return %arg1, %arg0 : i32, i32
  }
}

</mosaic_0001>

<bundles_post_ra>
// kernel: tpu_custom_call.1
= control target key start
LH: loop header
LB: loop body
LE: loop exit
PB: predicated region body
PF: predicated region fallthrough
CT: control target
= control target key end

     0   :  { %vm44_vm0 = vcmask 261120   ;;  %v178_v2 = vmov 0.0   ;;  %vm179_vm1 = vmmov 0   ;;  %s258_s0 = inlined_call_operand.vmem [shape: f32[16,32], index: 0, kind: input, shape index: {}]   ;;  %s259_s1 = inlined_call_operand.vmem [shape: f32[96,32], index: 1, kind: input, shape index: {}]   ;;  %s260_s2 = inlined_call_operand.vmem [shape: f32[1,96], index: 2, kind: input, shape index: {}]   ;;  %s261_s3 = inlined_call_operand.hbm [shape: f32[16,96], index: 3, kind: output, shape index: {}]  }
   0x1   :  { %v29_v0 = vld [vmem:[%s259_s1 + $0x50] sm:$0xff]  ;;  %v30_v1 = vld [vmem:[%s259_s1 + $0x58] sm:$0xff]  ;;  %135 = vmatprep.subr.bf16.mxu0 %v178_v2  ;;  %147 = vmatprep.mubr.msk.bf16.mxu0 %vm179_vm1, %v178_v2  ;;  %v27_v4 = vld [vmem:[%s259_s1 + $0x40] sm:$0xff] }
   0x2   :  { %v36_v3 = vpack.c.bf16 %v30_v1, %v29_v0  ;;  %v28_v5 = vld [vmem:[%s259_s1 + $0x48] sm:$0xff] }
   0x3   :  { %v35_v7 = vpack.c.bf16 %v28_v5, %v27_v4 }
   0x4   :  { %v64_v6 = vsel %vm44_vm0, %v36_v3, 0 }
   0x5   :  { %136 = vmatpush3.bf16.xpose.msra.mxu0 %v64_v6 }
   0x6   :  { %137 = vmatprep.subr.bf16.mxu0 %v178_v2 }
   0x7   :  { %8 = vsyncpa [#allocation3], 0  ;;  %v61_v8 = vsel %vm44_vm0, %v35_v7, 0  ;;  %v25_v9 = vld [vmem:[%s259_s1 + $0x30] sm:$0xff]  ;;  %v26_v10 = vld [vmem:[%s259_s1 + $0x38] sm:$0xff]  ;;  %vm107_vm2 = vcmask 785408  }
   0x8   :  { %v34_v11 = vpack.c.bf16 %v26_v10, %v25_v9  ;;  %v23_v13 = vld [vmem:[%s259_s1 + $0x20] sm:$0xff]  ;;  %v24_v14 = vld [vmem:[%s259_s1 + $0x28] sm:$0xff]  ;;  %v21_v17 = vld [vmem:[%s259_s1 + $0x10] sm:$0xff] }
   0x9   :  { %v33_v15 = vpack.c.bf16 %v24_v14, %v23_v13  ;;  %v22_v18 = vld [vmem:[%s259_s1 + $0x18] sm:$0xff]  ;;  %v19_v21 = vld [vmem:[%s259_s1] sm:$0xff]  ;;  %v20_v22 = vld [vmem:[%s259_s1 + $0x8] sm:$0xff]  ;;  %s180_s1 = smov [#allocation2]  }
   0xa   :  { %v58_v12 = vsel %vm44_vm0, %v34_v11, 0  ;;  %v32_v19 = vpack.c.bf16 %v22_v18, %v21_v17  ;;  %v31_v23 = vpack.c.bf16 %v20_v22, %v19_v21  ;;  %v16_v25 = vld [vmem:[%s258_s0] sm:$0xff]  ;;  %v17_v26 = vld [vmem:[%s258_s0 + $0x8] sm:$0xff]  ;;  %s115_s15 = sshll.u32 %s180_s1, 4  ;;  %s116_s15 = int_to_ptr.vmem [resolvable:$true] %s115_s15 }
   0xb   :  { %v55_v16 = vsel %vm44_vm0, %v33_v15, 0  ;;  %v18_v27 = vpack.c.bf16 %v17_v26, %v16_v25  ;;  %v126_v28 = vld [vmem:[%s260_s2] ss:$0 sm:$0xff]  ;;  %s156_s0 = scalar_lea.vmem %s116_s15, 256  ;;  %p161_p1 = scmp.lt.s32.totalorder %s116_s15, %s116_s15 }
   0xc   :  { %v52_v20 = vsel %vm44_vm0, %v32_v19, 0  ;;  %v49_v24 = vsel %vm44_vm0, %v31_v23, 0  ;;  %p157_p0 = scmp.ne.s32.totalorder %s116_s15, %s156_s0  ;;  %p162_p2 = scmp.lt.s32.totalorder %s156_s0, %s156_s0 }
   0xd   :  { %138 = vmatpush3.bf16.xpose.msra.mxu0 %v61_v8 }
   0xe   :  { %139 = vmatprep.subr.bf16.mxu0 %v178_v2  ;;  %p163_p3 = por %p162_p2, %p161_p1 }
  0x10   :  { %p164_p4 = pnand %p163_p3, %p157_p0 }
  0x15   :  { %140 = vmatpush3.bf16.xpose.msra.mxu0 %v58_v12 }
  0x16   :  { %141 = vmatprep.subr.bf16.mxu0 %v178_v2 }
  0x1d   :  { %142 = vmatpush3.bf16.xpose.msra.mxu0 %v55_v16 }
  0x1e   :  { %143 = vmatprep.subr.bf16.mxu0 %v178_v2 }
  0x25   :  { %144 = vmatpush3.bf16.xpose.msra.mxu0 %v52_v20 }
  0x26   :  { %145 = vmatprep.subr.bf16.mxu0 %v178_v2 }
  0x2d   :  { %146 = vmatpush3.bf16.xpose.msra.mxu0 %v49_v24 }
  0x34   :  { %148 = vmatmul.mubr.msk.bf16.vlgmr.msra.gmra.mxu0 %vm44_vm0, %v18_v27 }
  0xf4   :  { %v100_v29 = vpop.f32.mrf.mxu0 }
  0xf5   :  { %v101_v30 = vadd.f32 %v126_v28, %v100_v29 }
  0xf6   :  { %v149_v31 = vpop.f32.mrf.mxu0 }
  0xf7   :  { %108 = vst.msk [vmem:[#allocation2] sm:$0xff] %vm107_vm2, %v101_v30 }
  0xf8   :  { %v103_v32 = vpop.f32.mrf.mxu0 }
  0xf9   :  { %v104_v33 = vadd.f32 %v126_v28, %v103_v32 }
  0xfa   :  { %v150_v34 = vpop.f32.mrf.mxu0 }
  0xfb   :  { %109 = vst.msk [vmem:[#allocation2 + $0x8] sm:$0xff] %vm107_vm2, %v104_v33 }
  0xfc   :  { %167 = shalt.err (!%p164_p4)
}
  0xfd   :  { %s181_s2 = smov 128   ;;  %s182_s16 = smov 8  }
  0xfe   :  { %121 = dma.vmem_to_hbm [thread:$0]  %s116_s15, 256, %s261_s3, [#allocation3], %s181_s2, %s181_s2, %s182_s16  }
  0xff   :  { %176 = dma.done.wait [#allocation3], 256  }
 0x100   :  { %177 = vsyncadd [#allocation3], 4294967040 }
 0x101   :  { %125 = vsyncpa [#allocation3], 1 }

</bundles_post_ra>
